<compile_context>
chip_gen: v6e
topology: v6e:2x2x1
jax: 0.10.0
libtpu: 0.0.40
codegen_flags: <defaults>
</compile_context>

<pallas_src>
import jax
import jax.numpy as jnp
from jax.experimental import pallas as pl
from jax.experimental.pallas import tpu as pltpu

NEG_SLOPE = 0.01  # PyTorch nn.LeakyReLU default


def _leaky_relu(x):
    # max(x, a*x) == LeakyReLU(x) for 0 < a < 1; saves a VPU op vs where().
    return jnp.maximum(x, NEG_SLOPE * x)


def _round_up(x, m):
    return ((x + m - 1) // m) * m


# --------------------------------------------------------------------------
# Kernel
# --------------------------------------------------------------------------
def reward_net_kernel(x_ref, w1_ref, b1_ref, w2_ref, b2_ref, w3_ref, b3_ref,
                      o_ref):
    # Layer 1: [tb, in] @ [in, hid]  (bf16 MXU inputs, f32 accumulate)
    xb = x_ref[...].astype(jnp.bfloat16)
    h = jnp.dot(xb, w1_ref[...], preferred_element_type=jnp.float32)
    h = _leaky_relu(h + b1_ref[...])                       # f32 on the VPU
    # Layer 2: [tb, hid] @ [hid, hid]
    h = jnp.dot(h.astype(jnp.bfloat16), w2_ref[...],
                preferred_element_type=jnp.float32)
    h = _leaky_relu(h + b2_ref[...])                       # f32 on the VPU
    # Output layer (hid -> 1): VPU/XLU lane-reduce instead of a degenerate
    # N=1 MXU matmul; w3 is a resident (1, hid) f32 row, b3 a scalar in SMEM.
    out = jnp.sum(h * w3_ref[...], axis=-1, keepdims=True) + b3_ref[0, 0]
    o_ref[...] = out.astype(o_ref.dtype)


# --------------------------------------------------------------------------
# Tiling / VMEM heuristics
# --------------------------------------------------------------------------
def _vmem_limit_bytes():
    try:
        cap = int(pltpu.get_tpu_info().vmem_capacity_bytes)
    except Exception:
        cap = 64 * 1024 * 1024  # conservative: v7x per-TensorCore VMEM
    # Leave ~25% headroom for Mosaic-internal scratch; cap for sanity.
    return min((cap * 3) // 4, 112 * 1024 * 1024)


def _pick_tiling(batch_work, in_dim, hid_p, x_itemsize, batch_tile=None):
    """Returns (batch_tile_rows, vmem_limit_bytes)."""
    vmem_limit = _vmem_limit_bytes()
    max_rows = (batch_work // 8) * 8          # batch_work >= 8 always

    if batch_tile is not None:
        tb = max(8, _round_up(batch_tile, 8))
        return min(tb, max_rows), vmem_limit

    # Resident weights / biases (counted double-buffered for safety even
    # though we request Buffered(1) on them).
    weight_bytes = 2 * (in_dim * hid_p * 2 + hid_p * hid_p * 2
                        + 3 * hid_p * 4 + 4096)
    # Per batch-row VMEM: double-buffered x block + in-kernel bf16 copy of x
    # + f32/bf16 hidden intermediates (~4 live (tb, hid_p) buffers) + the
    # double-buffered, lane-padded (tb, 1) output block.
    per_row = (2 * in_dim * x_itemsize + 2 * in_dim + 16 * hid_p
               + 2 * 128 * 4)
    budget = vmem_limit - weight_bytes - 4 * 1024 * 1024
    tb = max(8, min(8192, (budget // per_row) // 8 * 8))
    tb = min(tb, max_rows)

    # Guarantee >=2 grid steps (>=4 for very large batches) so the "parallel"
    # batch axis can shard across v7x's two TensorCores; the extra grid steps
    # are essentially free on single-core chips.
    if batch_work >= 2048:
        min_steps = 4
    elif batch_work >= 512:
        min_steps = 2
    else:
        min_steps = 1
    if min_steps > 1:
        tb = min(tb, _round_up(pl.cdiv(batch_work, min_steps), 8))
    return max(8, tb), vmem_limit


# --------------------------------------------------------------------------
# Parameter preparation (hoisted out of the hot path)
# --------------------------------------------------------------------------
def prepare_reward_net_params(params):
    """One-time pad + dtype-cast of the weights (call once, reuse)."""
    in_dim, hid = params["w1"].shape
    hid_p = _round_up(hid, 128)
    ph = hid_p - hid
    w1 = jnp.pad(params["w1"], ((0, 0), (0, ph))).astype(jnp.bfloat16)
    w2 = jnp.pad(params["w2"], ((0, ph), (0, ph))).astype(jnp.bfloat16)
    b1 = jnp.pad(params["b1"], (0, ph)).reshape(1, hid_p).astype(jnp.float32)
    b2 = jnp.pad(params["b2"], (0, ph)).reshape(1, hid_p).astype(jnp.float32)
    w3 = jnp.pad(params["w3"].reshape(1, hid),
                 ((0, 0), (0, ph))).astype(jnp.float32)
    b3 = params["b3"].reshape(1, 1).astype(jnp.float32)
    return {"w1": w1, "b1": b1, "w2": w2, "b2": b2, "w3": w3, "b3": b3,
            "in_dim": in_dim, "hid": hid, "hid_p": hid_p}


# --------------------------------------------------------------------------
# Forward
# --------------------------------------------------------------------------
def _build_in_specs(in_dim, hid_p, tb, single_buffer_weights):
    wkw = {"pipeline_mode": pl.Buffered(1)} if single_buffer_weights else {}
    return [
        pl.BlockSpec((tb, in_dim), lambda i: (i, 0)),              # x tile
        pl.BlockSpec((in_dim, hid_p), lambda i: (0, 0), **wkw),    # w1
        pl.BlockSpec((1, hid_p), lambda i: (0, 0), **wkw),         # b1
        pl.BlockSpec((hid_p, hid_p), lambda i: (0, 0), **wkw),     # w2
        pl.BlockSpec((1, hid_p), lambda i: (0, 0), **wkw),         # b2
        pl.BlockSpec((1, hid_p), lambda i: (0, 0), **wkw),         # w3 row
        pl.BlockSpec(memory_space=pltpu.MemorySpace.SMEM),         # b3 scalar
    ]


def _pallas_forward(xp, p, tb, vmem_limit, single_buffer_weights):
    B_work, in_dim = xp.shape
    hid_p = p["hid_p"]
    grid = (pl.cdiv(B_work, tb),)

    flops = 2 * B_work * (in_dim * hid_p + hid_p * hid_p + hid_p)
    bytes_accessed = (B_work * in_dim * xp.dtype.itemsize      # x
                      + (in_dim * hid_p + hid_p * hid_p) * 2   # bf16 weights
                      + (3 * hid_p + 1) * 4                    # biases + w3
                      + B_work * 4)                            # output

    return pl.pallas_call(
        reward_net_kernel,
        out_shape=jax.ShapeDtypeStruct((B_work, 1), jnp.float32),
        grid_spec=pltpu.PrefetchScalarGridSpec(
            num_scalar_prefetch=0,
            grid=grid,
            in_specs=_build_in_specs(in_dim, hid_p, tb, single_buffer_weights),
            out_specs=pl.BlockSpec((tb, 1), lambda i: (i, 0)),
        ),
        compiler_params=pltpu.CompilerParams(
            dimension_semantics=("parallel",),
            vmem_limit_bytes=int(vmem_limit),
        ),
        cost_estimate=pl.CostEstimate(
            flops=int(flops),
            transcendentals=0,
            bytes_accessed=int(bytes_accessed)),
    )(xp, p["w1"], p["b1"], p["w2"], p["b2"], p["w3"], p["b3"])


def reward_net_forward(x, params=None, *, prepared=None, batch_tile=None):
    """Fused RewardNet forward: x [B, input_dim] -> [B, 1] float32.

    params: dict with w1 [in,hid], b1 [hid], w2 [hid,hid], b2 [hid],
            w3 [hid,1], b3 [1]  (weights stored as [in, out]).
    Pass `prepared=prepare_reward_net_params(params)` to avoid re-padding /
    re-casting the weights on every call.
    """
    if prepared is None:
        prepared = prepare_reward_net_params(params)
    B, in_dim = x.shape
    assert in_dim == prepared["in_dim"]
    hid_p = prepared["hid_p"]

    # Only tiny batches (<8 rows) get padded; otherwise x goes to the kernel
    # untouched and the ragged last block is handled by the pipeline (each
    # output row depends only on its own x row, so garbage rows are harmless).
    xp, B_work = x, B
    if B < 8:
        B_work = 8
        xp = jnp.pad(x, ((0, 8 - B), (0, 0)))

    tb, vmem_limit = _pick_tiling(B_work, in_dim, hid_p, x.dtype.itemsize,
                                  batch_tile)
    try:
        out = _pallas_forward(xp, prepared, tb, vmem_limit, True)
    except Exception:
        # pipeline_mode=pl.Buffered(1) not supported on this JAX version;
        # fall back to default double-buffered weights (small VMEM cost).
        out = _pallas_forward(xp, prepared, tb, vmem_limit, False)

    if B_work != B:
        out = out[:B]
    return out


# --------------------------------------------------------------------------
# Reference / init helpers
# --------------------------------------------------------------------------
def init_reward_net_params(key, input_dim, hidden_dim=256, num_layers=2):
    """Deterministic synthetic params. Weights stored as [in, out]."""
    assert num_layers == 2  # matches the reference module default
    k1, k2, k3, k4, k5, k6 = jax.random.split(key, 6)

    def lin(kw, kb, fan_in, fan_out):
        # PyTorch Linear default init: U(-1/sqrt(fan_in), 1/sqrt(fan_in))
        bound = 1.0 / jnp.sqrt(fan_in)
        w = jax.random.uniform(kw, (fan_in, fan_out), jnp.float32,
                               -bound, bound)
        b = jax.random.uniform(kb, (fan_out,), jnp.float32, -bound, bound)
        return w, b

    w1, b1 = lin(k1, k2, input_dim, hidden_dim)
    w2, b2 = lin(k3, k4, hidden_dim, hidden_dim)
    w3, b3 = lin(k5, k6, hidden_dim, 1)
    return {"w1": w1, "b1": b1, "w2": w2, "b2": b2, "w3": w3, "b3": b3}


def reward_net_ref_f32(x, p):
    """Pure-JAX full-f32 reference (matches the PyTorch module)."""
    h = _leaky_relu(x @ p["w1"] + p["b1"])
    h = _leaky_relu(h @ p["w2"] + p["b2"])
    return h @ p["w3"] + p["b3"]


def reward_net_ref_bf16(x, p):
    """Pure-JAX reference using the same bf16-input / f32-accumulate recipe."""
    h = jnp.dot(x.astype(jnp.bfloat16), p["w1"].astype(jnp.bfloat16),
                preferred_element_type=jnp.float32) + p["b1"]
    h = _leaky_relu(h)
    h = jnp.dot(h.astype(jnp.bfloat16), p["w2"].astype(jnp.bfloat16),
                preferred_element_type=jnp.float32) + p["b2"]
    h = _leaky_relu(h)
    return jnp.sum(h * p["w3"].reshape(1, -1), axis=-1,
                   keepdims=True) + p["b3"]


if __name__ == "__main__":
    key = jax.random.PRNGKey(0)
    kp, kx = jax.random.split(key)

    batch = 2
    input_dim = 16
    hidden_dim = 32

    params = init_reward_net_params(kp, input_dim, hidden_dim=hidden_dim,
                                    num_layers=2)
    prepared = prepare_reward_net_params(params)
    x = jax.random.normal(kx, (batch, input_dim), jnp.float32)

    out = jax.block_until_ready(reward_net_forward(x, prepared=prepared))
    assert out.shape == (batch, 1)
    # Tight check vs a reference using the same bf16/f32 recipe, loose check
    # vs the pure-f32 PyTorch-equivalent reference.
    assert jnp.allclose(out, reward_net_ref_bf16(x, params),
                        atol=1e-3, rtol=1e-3)
    assert jnp.allclose(out, reward_net_ref_f32(x, params),
                        atol=5e-2, rtol=5e-2)

    # Exercise a multi-step grid with a ragged last block (no batch padding).
    x2 = jax.random.normal(jax.random.PRNGKey(1), (20, input_dim),
                           jnp.float32)
    out2 = jax.block_until_ready(
        reward_net_forward(x2, params, batch_tile=8))
    assert out2.shape == (20, 1)
    assert jnp.allclose(out2, reward_net_ref_bf16(x2, params),
                        atol=1e-3, rtol=1e-3)

    print("KERNEL_OK")
</pallas_src>

<mosaic_0001>
module attributes {stable_mosaic.version = 11 : i64} {
  func.func @reward_net_kernel(%arg0: i32, %arg1: memref<8x16xf32, #tpu.memory_space<vmem>>, %arg2: memref<16x128xbf16, #tpu.memory_space<vmem>>, %arg3: memref<1x128xf32, #tpu.memory_space<vmem>>, %arg4: memref<128x128xbf16, #tpu.memory_space<vmem>>, %arg5: memref<1x128xf32, #tpu.memory_space<vmem>>, %arg6: memref<1x128xf32, #tpu.memory_space<vmem>>, %arg7: memref<1x1xf32, #tpu.memory_space<smem>>, %arg8: memref<8x1xf32, #tpu.memory_space<vmem>>) attributes {dimension_semantics = [#tpu.dimension_semantics<parallel>], iteration_bounds = array<i64: 1>, scalar_prefetch = 0 : i64, scratch_operands = 0 : i64, tpu.core_type = #tpu.core_type<tc>, window_params = [{transform_indices = @transform_0, window_bounds = array<i64: 8, 16>}, {pipeline_mode = #tpu.pipeline_mode<synchronous>, transform_indices = @transform_1, window_bounds = array<i64: 16, 128>}, {pipeline_mode = #tpu.pipeline_mode<synchronous>, transform_indices = @transform_2, window_bounds = array<i64: 1, 128>}, {pipeline_mode = #tpu.pipeline_mode<synchronous>, transform_indices = @transform_3, window_bounds = array<i64: 128, 128>}, {pipeline_mode = #tpu.pipeline_mode<synchronous>, transform_indices = @transform_4, window_bounds = array<i64: 1, 128>}, {pipeline_mode = #tpu.pipeline_mode<synchronous>, transform_indices = @transform_5, window_bounds = array<i64: 1, 128>}, {transform_indices = @transform_6, window_bounds = array<i64: 1, 1>}, {transform_indices = @transform_7, window_bounds = array<i64: 8, 1>}]} {
    %c0 = arith.constant 0 : index
    %c0_0 = arith.constant 0 : index
    %0 = vector.load %arg1[%c0, %c0_0] : memref<8x16xf32, #tpu.memory_space<vmem>>, vector<8x16xf32>
    %1 = arith.truncf %0 : vector<8x16xf32> to vector<8x16xbf16>
    %c0_1 = arith.constant 0 : index
    %c0_2 = arith.constant 0 : index
    %2 = vector.load %arg2[%c0_1, %c0_2] : memref<16x128xbf16, #tpu.memory_space<vmem>>, vector<16x128xbf16>
    %cst = arith.constant dense<0.000000e+00> : vector<8x128xf32>
    %3 = tpu.matmul %1, %2, %cst {dimension_numbers = #tpu.dot_dimension_numbers<[1], [0], [0], [1], [0, 0, 1, 1], [], []>} : vector<8x16xbf16>, vector<16x128xbf16>, vector<8x128xf32> -> vector<8x128xf32>
    %c0_3 = arith.constant 0 : index
    %c0_4 = arith.constant 0 : index
    %4 = vector.load %arg3[%c0_3, %c0_4] : memref<1x128xf32, #tpu.memory_space<vmem>>, vector<1x128xf32>
    %5 = vector.broadcast %4 : vector<1x128xf32> to vector<8x128xf32>
    %6 = arith.addf %3, %5 : vector<8x128xf32>
    %cst_5 = arith.constant 0.00999999977 : f32
    %7 = vector.broadcast %cst_5 : f32 to vector<8x128xf32>
    %8 = arith.mulf %7, %6 : vector<8x128xf32>
    %9 = arith.maximumf %6, %8 : vector<8x128xf32>
    %10 = arith.truncf %9 : vector<8x128xf32> to vector<8x128xbf16>
    %c0_6 = arith.constant 0 : index
    %c0_7 = arith.constant 0 : index
    %11 = vector.load %arg4[%c0_6, %c0_7] : memref<128x128xbf16, #tpu.memory_space<vmem>>, vector<128x128xbf16>
    %cst_8 = arith.constant dense<0.000000e+00> : vector<8x128xf32>
    %12 = tpu.matmul %10, %11, %cst_8 {dimension_numbers = #tpu.dot_dimension_numbers<[1], [0], [0], [1], [0, 0, 1, 1], [], []>} : vector<8x128xbf16>, vector<128x128xbf16>, vector<8x128xf32> -> vector<8x128xf32>
    %c0_9 = arith.constant 0 : index
    %c0_10 = arith.constant 0 : index
    %13 = vector.load %arg5[%c0_9, %c0_10] : memref<1x128xf32, #tpu.memory_space<vmem>>, vector<1x128xf32>
    %14 = vector.broadcast %13 : vector<1x128xf32> to vector<8x128xf32>
    %15 = arith.addf %12, %14 : vector<8x128xf32>
    %cst_11 = arith.constant 0.00999999977 : f32
    %16 = vector.broadcast %cst_11 : f32 to vector<8x128xf32>
    %17 = arith.mulf %16, %15 : vector<8x128xf32>
    %18 = arith.maximumf %15, %17 : vector<8x128xf32>
    %c0_12 = arith.constant 0 : index
    %c0_13 = arith.constant 0 : index
    %19 = vector.load %arg6[%c0_12, %c0_13] : memref<1x128xf32, #tpu.memory_space<vmem>>, vector<1x128xf32>
    %20 = vector.broadcast %19 : vector<1x128xf32> to vector<8x128xf32>
    %21 = arith.mulf %18, %20 : vector<8x128xf32>
    %cst_14 = arith.constant dense<0.000000e+00> : vector<8xf32>
    %22 = vector.multi_reduction <add>, %21, %cst_14 [1] : vector<8x128xf32> to vector<8xf32>
    %23 = vector.shape_cast %22 : vector<8xf32> to vector<8x1xf32>
    %c0_15 = arith.constant 0 : index
    %c0_16 = arith.constant 0 : index
    %24 = memref.load %arg7[%c0_15, %c0_16] : memref<1x1xf32, #tpu.memory_space<smem>>
    %25 = vector.broadcast %24 : f32 to vector<8x1xf32>
    %26 = arith.addf %23, %25 : vector<8x1xf32>
    %c0_17 = arith.constant 0 : index
    %c0_18 = arith.constant 0 : index
    %27 = vector.load %arg8[%c0_17, %c0_18] : memref<8x1xf32, #tpu.memory_space<vmem>>, vector<8x1xf32>
    tpu.vector_store %arg8[%c0_17, %c0_18], %26 {strides = array<i32>} : memref<8x1xf32, #tpu.memory_space<vmem>>, vector<8x1xf32>,
    return
  }
  func.func @transform_0(%arg0: i32) -> (i32, i32) {
    %c0_i32 = arith.constant 0 : i32
    %c0_i32_0 = arith.constant 0 : i32
    return %arg0, %c0_i32 : i32, i32
  }
  func.func @transform_1(%arg0: i32) -> (i32, i32) {
    %c0_i32 = arith.constant 0 : i32
    %c0_i32_0 = arith.constant 0 : i32
    %c0_i32_1 = arith.constant 0 : i32
    return %c0_i32, %c0_i32_0 : i32, i32
  }
  func.func @transform_2(%arg0: i32) -> (i32, i32) {
    %c0_i32 = arith.constant 0 : i32
    %c0_i32_0 = arith.constant 0 : i32
    %c0_i32_1 = arith.constant 0 : i32
    return %c0_i32, %c0_i32_0 : i32, i32
  }
  func.func @transform_3(%arg0: i32) -> (i32, i32) {
    %c0_i32 = arith.constant 0 : i32
    %c0_i32_0 = arith.constant 0 : i32
    %c0_i32_1 = arith.constant 0 : i32
    return %c0_i32, %c0_i32_0 : i32, i32
  }
  func.func @transform_4(%arg0: i32) -> (i32, i32) {
    %c0_i32 = arith.constant 0 : i32
    %c0_i32_0 = arith.constant 0 : i32
    %c0_i32_1 = arith.constant 0 : i32
    return %c0_i32, %c0_i32_0 : i32, i32
  }
  func.func @transform_5(%arg0: i32) -> (i32, i32) {
    %c0_i32 = arith.constant 0 : i32
    %c0_i32_0 = arith.constant 0 : i32
    %c0_i32_1 = arith.constant 0 : i32
    return %c0_i32, %c0_i32_0 : i32, i32
  }
  func.func @transform_6(%arg0: i32) -> (i32, i32) {
    %c0_i32 = arith.constant 0 : i32
    %c0_i32_0 = arith.constant 0 : i32
    %c0_i32_1 = arith.constant 0 : i32
    return %c0_i32, %c0_i32_0 : i32, i32
  }
  func.func @transform_7(%arg0: i32) -> (i32, i32) {
    %c0_i32 = arith.constant 0 : i32
    %c0_i32_0 = arith.constant 0 : i32
    return %arg0, %c0_i32 : i32, i32
  }
}

module attributes {stable_mosaic.version = 11 : i64} {
  func.func @reward_net_kernel(%arg0: i32, %arg1: memref<8x16xf32, #tpu.memory_space<vmem>>, %arg2: memref<16x128xbf16, #tpu.memory_space<vmem>>, %arg3: memref<1x128xf32, #tpu.memory_space<vmem>>, %arg4: memref<128x128xbf16, #tpu.memory_space<vmem>>, %arg5: memref<1x128xf32, #tpu.memory_space<vmem>>, %arg6: memref<1x128xf32, #tpu.memory_space<vmem>>, %arg7: memref<1x1xf32, #tpu.memory_space<smem>>, %arg8: memref<8x1xf32, #tpu.memory_space<vmem>>) attributes {dimension_semantics = [#tpu.dimension_semantics<parallel>], iteration_bounds = array<i64: 1>, scalar_prefetch = 0 : i64, scratch_operands = 0 : i64, tpu.core_type = #tpu.core_type<tc>, window_params = [{transform_indices = @transform_0, window_bounds = array<i64: 8, 16>}, {pipeline_mode = #tpu.pipeline_mode<synchronous>, transform_indices = @transform_1, window_bounds = array<i64: 16, 128>}, {pipeline_mode = #tpu.pipeline_mode<synchronous>, transform_indices = @transform_2, window_bounds = array<i64: 1, 128>}, {pipeline_mode = #tpu.pipeline_mode<synchronous>, transform_indices = @transform_3, window_bounds = array<i64: 128, 128>}, {pipeline_mode = #tpu.pipeline_mode<synchronous>, transform_indices = @transform_4, window_bounds = array<i64: 1, 128>}, {pipeline_mode = #tpu.pipeline_mode<synchronous>, transform_indices = @transform_5, window_bounds = array<i64: 1, 128>}, {transform_indices = @transform_6, window_bounds = array<i64: 1, 1>}, {transform_indices = @transform_7, window_bounds = array<i64: 8, 1>}]} {
    %c0 = arith.constant 0 : index
    %c0_0 = arith.constant 0 : index
    %0 = vector.load %arg1[%c0, %c0_0] : memref<8x16xf32, #tpu.memory_space<vmem>>, vector<8x16xf32>
    %1 = arith.truncf %0 : vector<8x16xf32> to vector<8x16xbf16>
    %c0_1 = arith.constant 0 : index
    %c0_2 = arith.constant 0 : index
    %2 = vector.load %arg2[%c0_1, %c0_2] : memref<16x128xbf16, #tpu.memory_space<vmem>>, vector<16x128xbf16>
    %cst = arith.constant dense<0.000000e+00> : vector<8x128xf32>
    %3 = tpu.matmul %1, %2, %cst {dimension_numbers = #tpu.dot_dimension_numbers<[1], [0], [0], [1], [0, 0, 1, 1], [], []>} : vector<8x16xbf16>, vector<16x128xbf16>, vector<8x128xf32> -> vector<8x128xf32>
    %c0_3 = arith.constant 0 : index
    %c0_4 = arith.constant 0 : index
    %4 = vector.load %arg3[%c0_3, %c0_4] : memref<1x128xf32, #tpu.memory_space<vmem>>, vector<1x128xf32>
    %5 = vector.broadcast %4 : vector<1x128xf32> to vector<8x128xf32>
    %6 = arith.addf %3, %5 : vector<8x128xf32>
    %cst_5 = arith.constant 0.00999999977 : f32
    %7 = vector.broadcast %cst_5 : f32 to vector<8x128xf32>
    %8 = arith.mulf %7, %6 : vector<8x128xf32>
    %9 = arith.maximumf %6, %8 : vector<8x128xf32>
    %10 = arith.truncf %9 : vector<8x128xf32> to vector<8x128xbf16>
    %c0_6 = arith.constant 0 : index
    %c0_7 = arith.constant 0 : index
    %11 = vector.load %arg4[%c0_6, %c0_7] : memref<128x128xbf16, #tpu.memory_space<vmem>>, vector<128x128xbf16>
    %cst_8 = arith.constant dense<0.000000e+00> : vector<8x128xf32>
    %12 = tpu.matmul %10, %11, %cst_8 {dimension_numbers = #tpu.dot_dimension_numbers<[1], [0], [0], [1], [0, 0, 1, 1], [], []>} : vector<8x128xbf16>, vector<128x128xbf16>, vector<8x128xf32> -> vector<8x128xf32>
    %c0_9 = arith.constant 0 : index
    %c0_10 = arith.constant 0 : index
    %13 = vector.load %arg5[%c0_9, %c0_10] : memref<1x128xf32, #tpu.memory_space<vmem>>, vector<1x128xf32>
    %14 = vector.broadcast %13 : vector<1x128xf32> to vector<8x128xf32>
    %15 = arith.addf %12, %14 : vector<8x128xf32>
    %cst_11 = arith.constant 0.00999999977 : f32
    %16 = vector.broadcast %cst_11 : f32 to vector<8x128xf32>
    %17 = arith.mulf %16, %15 : vector<8x128xf32>
    %18 = arith.maximumf %15, %17 : vector<8x128xf32>
    %c0_12 = arith.constant 0 : index
    %c0_13 = arith.constant 0 : index
    %19 = vector.load %arg6[%c0_12, %c0_13] : memref<1x128xf32, #tpu.memory_space<vmem>>, vector<1x128xf32>
    %20 = vector.broadcast %19 : vector<1x128xf32> to vector<8x128xf32>
    %21 = arith.mulf %18, %20 : vector<8x128xf32>
    %cst_14 = arith.constant dense<0.000000e+00> : vector<8xf32>
    %22 = vector.multi_reduction <add>, %21, %cst_14 [1] : vector<8x128xf32> to vector<8xf32>
    %23 = vector.shape_cast %22 : vector<8xf32> to vector<8x1xf32>
    %c0_15 = arith.constant 0 : index
    %c0_16 = arith.constant 0 : index
    %24 = memref.load %arg7[%c0_15, %c0_16] : memref<1x1xf32, #tpu.memory_space<smem>>
    %25 = vector.broadcast %24 : f32 to vector<8x1xf32>
    %26 = arith.addf %23, %25 : vector<8x1xf32>
    %c0_17 = arith.constant 0 : index
    %c0_18 = arith.constant 0 : index
    %27 = vector.load %arg8[%c0_17, %c0_18] : memref<8x1xf32, #tpu.memory_space<vmem>>, vector<8x1xf32>
    tpu.vector_store %arg8[%c0_17, %c0_18], %26 {strides = array<i32>} : memref<8x1xf32, #tpu.memory_space<vmem>>, vector<8x1xf32>,
    return
  }
  func.func @transform_0(%arg0: i32) -> (i32, i32) {
    %c0_i32 = arith.constant 0 : i32
    %c0_i32_0 = arith.constant 0 : i32
    return %arg0, %c0_i32 : i32, i32
  }
  func.func @transform_1(%arg0: i32) -> (i32, i32) {
    %c0_i32 = arith.constant 0 : i32
    %c0_i32_0 = arith.constant 0 : i32
    %c0_i32_1 = arith.constant 0 : i32
    return %c0_i32, %c0_i32_0 : i32, i32
  }
  func.func @transform_2(%arg0: i32) -> (i32, i32) {
    %c0_i32 = arith.constant 0 : i32
    %c0_i32_0 = arith.constant 0 : i32
    %c0_i32_1 = arith.constant 0 : i32
    return %c0_i32, %c0_i32_0 : i32, i32
  }
  func.func @transform_3(%arg0: i32) -> (i32, i32) {
    %c0_i32 = arith.constant 0 : i32
    %c0_i32_0 = arith.constant 0 : i32
    %c0_i32_1 = arith.constant 0 : i32
    return %c0_i32, %c0_i32_0 : i32, i32
  }
  func.func @transform_4(%arg0: i32) -> (i32, i32) {
    %c0_i32 = arith.constant 0 : i32
    %c0_i32_0 = arith.constant 0 : i32
    %c0_i32_1 = arith.constant 0 : i32
    return %c0_i32, %c0_i32_0 : i32, i32
  }
  func.func @transform_5(%arg0: i32) -> (i32, i32) {
    %c0_i32 = arith.constant 0 : i32
    %c0_i32_0 = arith.constant 0 : i32
    %c0_i32_1 = arith.constant 0 : i32
    return %c0_i32, %c0_i32_0 : i32, i32
  }
  func.func @transform_6(%arg0: i32) -> (i32, i32) {
    %c0_i32 = arith.constant 0 : i32
    %c0_i32_0 = arith.constant 0 : i32
    %c0_i32_1 = arith.constant 0 : i32
    return %c0_i32, %c0_i32_0 : i32, i32
  }
  func.func @transform_7(%arg0: i32) -> (i32, i32) {
    %c0_i32 = arith.constant 0 : i32
    %c0_i32_0 = arith.constant 0 : i32
    return %arg0, %c0_i32 : i32, i32
  }
}

</mosaic_0001>

<bundles_post_ra>
// kernel: tpu_custom_call.1
= control target key start
LH: loop header
LB: loop body
LE: loop exit
PB: predicated region body
PF: predicated region fallthrough
CT: control target
= control target key end

     0   :  { %13 = vsyncpa [#allocation4], 0  ;;  %s466_s0 = inlined_call_operand.hbm [shape: f32[8,16], index: 0, kind: input, shape index: {}]   ;;  %s467_s1 = inlined_call_operand.hbm [shape: bf16[16,128], index: 1, kind: input, shape index: {}]   ;;  %s468_s2 = inlined_call_operand.vmem [shape: f32[1,128], index: 2, kind: input, shape index: {}]   ;;  %s469_s3 = inlined_call_operand.hbm [shape: bf16[128,128], index: 3, kind: input, shape index: {}]   ;;  %s470_s4 = inlined_call_operand.vmem [shape: f32[1,128], index: 4, kind: input, shape index: {}]   ;;  %s471_s5 = inlined_call_operand.vmem [shape: f32[1,128], index: 5, kind: input, shape index: {}]   ;;  %s472_s6 = inlined_call_operand.<no memory space> [shape: f32[1,1], index: 6, kind: input, shape index: {}]   ;;  %s473_s7 = inlined_call_operand.vmem [shape: f32[8,1], index: 7, kind: output, shape index: {}]  }
   0x1   :  { %14 = vsyncpa [#allocation6], 0  ;;  %s395_s24 = smov [#allocation5]  }
   0x2   :  { %s30_s25 = sshll.u32 %s395_s24, 4  ;;  %s31_s25 = int_to_ptr.vmem [resolvable:$true] %s30_s25 }
   0x3   :  { %s339_s26 = scalar_lea.vmem %s31_s25, 128  ;;  %p344_p1 = scmp.lt.s32.totalorder %s31_s25, %s31_s25 }
   0x4   :  { %p340_p0 = scmp.ne.s32.totalorder %s31_s25, %s339_s26  ;;  %p345_p2 = scmp.lt.s32.totalorder %s339_s26, %s339_s26 }
   0x6   :  { %p346_p3 = por %p345_p2, %p344_p1 }
   0x8   :  { %p347_p4 = pnand %p346_p3, %p340_p0 }
   0xa   :  { %350 = shalt.err (!%p347_p4)
}
   0xb   :  { %s396_s27 = smov 64   ;;  %s397_s28 = smov 4  }
   0xc   :  { %36 = dma.hbm_to_vmem [thread:$0]  %s467_s1, 128, %s31_s25, [#allocation6], %s396_s27, %s396_s27, %s397_s28  }
   0xd   :  { %s398_s8 = smov [#allocation3]   ;;  %s399_s10 = smov [#allocation7]  }
   0xe   :  { %s21_s9 = sshll.u32 %s398_s8, 4  ;;  %s44_s11 = sshll.u32 %s399_s10, 4  ;;  %s22_s9 = int_to_ptr.vmem [resolvable:$true] %s21_s9  ;;  %s45_s11 = int_to_ptr.vmem [resolvable:$true] %s44_s11 }
   0xf   :  { %s359_s12 = scalar_lea.vmem %s22_s9, 128  ;;  %p364_p6 = scmp.lt.s32.totalorder %s22_s9, %s22_s9 }
  0x10   :  { %p360_p5 = scmp.ne.s32.totalorder %s22_s9, %s359_s12  ;;  %p365_p7 = scmp.lt.s32.totalorder %s359_s12, %s359_s12 }
  0x12   :  { %p366_p8 = por %p365_p7, %p364_p6 }
  0x14   :  { %p367_p9 = pnand %p366_p8, %p360_p5 }
  0x16   :  { %370 = shalt.err (!%p367_p9)
}
  0x17   :  { %24 = dma.hbm_to_vmem [thread:$0]  %s466_s0, 128, %s22_s9, [#allocation4]  }
  0x18   :  { %s379_s15 = scalar_lea.vmem %s45_s11, 1024  ;;  %p384_p11 = scmp.lt.s32.totalorder %s45_s11, %s45_s11 }
  0x19   :  { %p380_p10 = scmp.ne.s32.totalorder %s45_s11, %s379_s15  ;;  %p385_p12 = scmp.lt.s32.totalorder %s379_s15, %s379_s15 }
  0x1b   :  { %p386_p13 = por %p385_p12, %p384_p11 }
  0x1d   :  { %p387_p0 = pnand %p386_p13, %p380_p10 }
  0x1f   :  { %390 = shalt.err (!%p387_p0)
}
  0x20   :  { %50 = dma.hbm_to_vmem [thread:$0]  %s469_s3, 1024, %s45_s11, [#allocation6], %s396_s27, %s396_s27, %s397_s28  }
  0x21   :  { %391 = dma.done.wait [#allocation4], 128  }
  0x22   :  { %392 = vsyncadd [#allocation4], 4294967168 }
  0x23   :  { %393 = dma.done.wait [#allocation6], 1152  }
  0x24   :  { %394 = vsyncadd [#allocation6], 4294966144  ;;  %v400_v0 = vmov 0.0   ;;  %vm401_vm0 = vmmov 0   ;;  %v322_v1 = vld [vmem:[#allocation5] sm:$0xff]   ;;  %v67_v2 = vld [vmem:[#allocation3] sm:$0xff]  ;;  %v255_v31 = vstv %s472_s6 }
  0x25   :  { %289 = vmatprep.subr.bf16.mxu0 %v400_v0  ;;  %291 = vmatprep.mubr.msk.bf16.mxu0 %vm401_vm0, %v400_v0  ;;  %v68_v3 = vpack.c.bf16 %v67_v2, %v67_v2  ;;  %vm84_vm1 = vcmask 130048   ;;  %v323_v4 = vld [vmem:[#allocation7 + $0x38] sm:$0xff]   ;;  %v324_v5 = vld [vmem:[#allocation7 + $0x30] sm:$0xff]   ;;  %v325_v6 = vld [vmem:[#allocation7 + $0x28] sm:$0xff]   ;;  %vm257_vm2 = vcmask 7168  }
  0x26   :  { %295 = vmatprep.subr.bf16.mxu1 %v400_v0  ;;  %311 = vmatprep.mubr.msk.bf16.mxu1 %vm401_vm0, %v400_v0  ;;  %v326_v7 = vld [vmem:[#allocation7 + $0x20] sm:$0xff]   ;;  %v327_v8 = vld [vmem:[#allocation7 + $0x18] sm:$0xff]   ;;  %v328_v9 = vld [vmem:[#allocation7 + $0x10] sm:$0xff]  }
  0x27   :  { %290 = vmatpush3.bf16.msra.mxu0 %v322_v1  ;;  %296 = vmatpush3.bf16.msra.mxu1 %v323_v4  ;;  %v329_v10 = vld [vmem:[#allocation7 + $0x8] sm:$0xff]   ;;  %v330_v11 = vld [vmem:[#allocation7] sm:$0xff]   ;;  %v265_v12 = vld [vmem:[%s468_s2] ss:$0 sm:$0xff] }
  0x28   :  { %297 = vmatprep.subr.bf16.mxu1 %v400_v0  ;;  %v268_v21 = vld [vmem:[%s470_s4] ss:$0 sm:$0xff] }
  0x29   :  { %v277_v27 = vld [vmem:[%s471_s5] ss:$0 sm:$0xff] }
  0x2a   :  { %292 = vmatmul.mubr.msk.bf16.vlgmr.msra.gmra.mxu0 %vm84_vm1, %v68_v3 }
  0x2b   :  { %298 = vmatpush3.bf16.msra.mxu1 %v324_v5 }
  0x2c   :  { %299 = vmatprep.subr.bf16.mxu1 %v400_v0 }
  0x2f   :  { %300 = vmatpush3.bf16.msra.mxu1 %v325_v6 }
  0x30   :  { %301 = vmatprep.subr.bf16.mxu1 %v400_v0 }
  0x33   :  { %302 = vmatpush3.bf16.msra.mxu1 %v326_v7 }
  0x34   :  { %303 = vmatprep.subr.bf16.mxu1 %v400_v0 }
  0x37   :  { %304 = vmatpush3.bf16.msra.mxu1 %v327_v8 }
  0x38   :  { %305 = vmatprep.subr.bf16.mxu1 %v400_v0 }
  0x3b   :  { %306 = vmatpush3.bf16.msra.mxu1 %v328_v9 }
  0x3c   :  { %307 = vmatprep.subr.bf16.mxu1 %v400_v0 }
  0x3f   :  { %308 = vmatpush3.bf16.msra.mxu1 %v329_v10 }
  0x40   :  { %309 = vmatprep.subr.bf16.mxu1 %v400_v0 }
  0x43   :  { %310 = vmatpush3.bf16.msra.mxu1 %v330_v11 }
  0xea   :  { %v122_v13 = vpop.f32.mrf.mxu0 }
  0xeb   :  { %v123_v14 = vadd.f32 %v265_v12, %v122_v13 }
  0xec   :  { %v293_v15 = vpop.f32.mrf.mxu0 }
  0xed   :  { %v128_v16 = vmul.f32 0.01, %v123_v14 }
  0xee   :  { %v125_v17 = vpop.f32.mrf.mxu0 }
  0xef   :  { %v129_v18 = vmax.f32 %v123_v14, %v128_v16 }
  0xf0   :  { %v294_v19 = vpop.f32.mrf.mxu0 }
  0xf1   :  { %v130_v20 = vpack.c.bf16 %v129_v18, %v129_v18 }
  0xf3   :  { %312 = vmatmul.mubr.bf16.vlgmr.msra.gmra.mxu1 %v130_v20 }
 0x1b3   :  { %v236_v22 = vpop.f32.mrf.mxu1 }
 0x1b4   :  { %v237_v23 = vadd.f32 %v268_v21, %v236_v22 }
 0x1b5   :  { %v313_v24 = vpop.f32.mrf.mxu1 }
 0x1b6   :  { %v242_v25 = vmul.f32 0.01, %v237_v23 }
 0x1b7   :  { %v239_v26 = vpop.f32.mrf.mxu1 }
 0x1b8   :  { %v243_v28 = vmax.f32 %v237_v23, %v242_v25 }
 0x1b9   :  { %v314_v29 = vpop.f32.mrf.mxu1 }
 0x1ba   :  { %v251_v30 = vmul.f32 %v277_v27, %v243_v28 }
 0x1bc   :  { %252 = vadd.xlane.f32.xlu0 %v251_v30 }
 0x245   :  { %v253_v32 = vpop.xlane.xlu0 %252 }
 0x246   :  { %v256_v33 = vadd.f32 %v255_v31, %v253_v32 }
 0x248   :  { %258 = vst.msk [vmem:[%s473_s7] sm:$0xff] %vm257_vm2, %v256_v33 }
 0x249   :  { %263 = vsyncpa [#allocation4], 1 }
 0x24a   :  { %264 = vsyncpa [#allocation6], 1 }

// kernel: tpu_custom_call.1
= control target key start
LH: loop header
LB: loop body
LE: loop exit
PB: predicated region body
PF: predicated region fallthrough
CT: control target
= control target key end

     0   :  { %13 = vsyncpa [#allocation4], 0  ;;  %s466_s0 = inlined_call_operand.hbm [shape: f32[8,16], index: 0, kind: input, shape index: {}]   ;;  %s467_s1 = inlined_call_operand.hbm [shape: bf16[16,128], index: 1, kind: input, shape index: {}]   ;;  %s468_s2 = inlined_call_operand.vmem [shape: f32[1,128], index: 2, kind: input, shape index: {}]   ;;  %s469_s3 = inlined_call_operand.hbm [shape: bf16[128,128], index: 3, kind: input, shape index: {}]   ;;  %s470_s4 = inlined_call_operand.vmem [shape: f32[1,128], index: 4, kind: input, shape index: {}]   ;;  %s471_s5 = inlined_call_operand.vmem [shape: f32[1,128], index: 5, kind: input, shape index: {}]   ;;  %s472_s6 = inlined_call_operand.<no memory space> [shape: f32[1,1], index: 6, kind: input, shape index: {}]   ;;  %s473_s7 = inlined_call_operand.vmem [shape: f32[8,1], index: 7, kind: output, shape index: {}]  }
   0x1   :  { %14 = vsyncpa [#allocation6], 0  ;;  %s395_s24 = smov [#allocation5]  }
   0x2   :  { %s30_s25 = sshll.u32 %s395_s24, 4  ;;  %s31_s25 = int_to_ptr.vmem [resolvable:$true] %s30_s25 }
   0x3   :  { %s339_s26 = scalar_lea.vmem %s31_s25, 128  ;;  %p344_p1 = scmp.lt.s32.totalorder %s31_s25, %s31_s25 }
   0x4   :  { %p340_p0 = scmp.ne.s32.totalorder %s31_s25, %s339_s26  ;;  %p345_p2 = scmp.lt.s32.totalorder %s339_s26, %s339_s26 }
   0x6   :  { %p346_p3 = por %p345_p2, %p344_p1 }
   0x8   :  { %p347_p4 = pnand %p346_p3, %p340_p0 }
   0xa   :  { %350 = shalt.err (!%p347_p4)
}
   0xb   :  { %s396_s27 = smov 64   ;;  %s397_s28 = smov 4  }
   0xc   :  { %36 = dma.hbm_to_vmem [thread:$0]  %s467_s1, 128, %s31_s25, [#allocation6], %s396_s27, %s396_s27, %s397_s28  }
   0xd   :  { %s398_s8 = smov [#allocation3]   ;;  %s399_s10 = smov [#allocation7]  }
   0xe   :  { %s21_s9 = sshll.u32 %s398_s8, 4  ;;  %s44_s11 = sshll.u32 %s399_s10, 4  ;;  %s22_s9 = int_to_ptr.vmem [resolvable:$true] %s21_s9  ;;  %s45_s11 = int_to_ptr.vmem [resolvable:$true] %s44_s11 }
   0xf   :  { %s359_s12 = scalar_lea.vmem %s22_s9, 128  ;;  %p364_p6 = scmp.lt.s32.totalorder %s22_s9, %s22_s9 }
  0x10   :  { %p360_p5 = scmp.ne.s32.totalorder %s22_s9, %s359_s12  ;;  %p365_p7 = scmp.lt.s32.totalorder %s359_s12, %s359_s12 }
  0x12   :  { %p366_p8 = por %p365_p7, %p364_p6 }
  0x14   :  { %p367_p9 = pnand %p366_p8, %p360_p5 }
  0x16   :  { %370 = shalt.err (!%p367_p9)
}
  0x17   :  { %24 = dma.hbm_to_vmem [thread:$0]  %s466_s0, 128, %s22_s9, [#allocation4]  }
  0x18   :  { %s379_s15 = scalar_lea.vmem %s45_s11, 1024  ;;  %p384_p11 = scmp.lt.s32.totalorder %s45_s11, %s45_s11 }
  0x19   :  { %p380_p10 = scmp.ne.s32.totalorder %s45_s11, %s379_s15  ;;  %p385_p12 = scmp.lt.s32.totalorder %s379_s15, %s379_s15 }
  0x1b   :  { %p386_p13 = por %p385_p12, %p384_p11 }
  0x1d   :  { %p387_p0 = pnand %p386_p13, %p380_p10 }
  0x1f   :  { %390 = shalt.err (!%p387_p0)
}
  0x20   :  { %50 = dma.hbm_to_vmem [thread:$0]  %s469_s3, 1024, %s45_s11, [#allocation6], %s396_s27, %s396_s27, %s397_s28  }
  0x21   :  { %391 = dma.done.wait [#allocation4], 128  }
  0x22   :  { %392 = vsyncadd [#allocation4], 4294967168 }
  0x23   :  { %393 = dma.done.wait [#allocation6], 1152  }
  0x24   :  { %394 = vsyncadd [#allocation6], 4294966144  ;;  %v400_v0 = vmov 0.0   ;;  %vm401_vm0 = vmmov 0   ;;  %v322_v1 = vld [vmem:[#allocation5] sm:$0xff]   ;;  %v67_v2 = vld [vmem:[#allocation3] sm:$0xff]  ;;  %v255_v31 = vstv %s472_s6 }
  0x25   :  { %289 = vmatprep.subr.bf16.mxu0 %v400_v0  ;;  %291 = vmatprep.mubr.msk.bf16.mxu0 %vm401_vm0, %v400_v0  ;;  %v68_v3 = vpack.c.bf16 %v67_v2, %v67_v2  ;;  %vm84_vm1 = vcmask 130048   ;;  %v323_v4 = vld [vmem:[#allocation7 + $0x38] sm:$0xff]   ;;  %v324_v5 = vld [vmem:[#allocation7 + $0x30] sm:$0xff]   ;;  %v325_v6 = vld [vmem:[#allocation7 + $0x28] sm:$0xff]   ;;  %vm257_vm2 = vcmask 7168  }
  0x26   :  { %295 = vmatprep.subr.bf16.mxu1 %v400_v0  ;;  %311 = vmatprep.mubr.msk.bf16.mxu1 %vm401_vm0, %v400_v0  ;;  %v326_v7 = vld [vmem:[#allocation7 + $0x20] sm:$0xff]   ;;  %v327_v8 = vld [vmem:[#allocation7 + $0x18] sm:$0xff]   ;;  %v328_v9 = vld [vmem:[#allocation7 + $0x10] sm:$0xff]  }
  0x27   :  { %290 = vmatpush3.bf16.msra.mxu0 %v322_v1  ;;  %296 = vmatpush3.bf16.msra.mxu1 %v323_v4  ;;  %v329_v10 = vld [vmem:[#allocation7 + $0x8] sm:$0xff]   ;;  %v330_v11 = vld [vmem:[#allocation7] sm:$0xff]   ;;  %v265_v12 = vld [vmem:[%s468_s2] ss:$0 sm:$0xff] }
  0x28   :  { %297 = vmatprep.subr.bf16.mxu1 %v400_v0  ;;  %v268_v21 = vld [vmem:[%s470_s4] ss:$0 sm:$0xff] }
  0x29   :  { %v277_v27 = vld [vmem:[%s471_s5] ss:$0 sm:$0xff] }
  0x2a   :  { %292 = vmatmul.mubr.msk.bf16.vlgmr.msra.gmra.mxu0 %vm84_vm1, %v68_v3 }
  0x2b   :  { %298 = vmatpush3.bf16.msra.mxu1 %v324_v5 }
  0x2c   :  { %299 = vmatprep.subr.bf16.mxu1 %v400_v0 }
  0x2f   :  { %300 = vmatpush3.bf16.msra.mxu1 %v325_v6 }
  0x30   :  { %301 = vmatprep.subr.bf16.mxu1 %v400_v0 }
  0x33   :  { %302 = vmatpush3.bf16.msra.mxu1 %v326_v7 }
  0x34   :  { %303 = vmatprep.subr.bf16.mxu1 %v400_v0 }
  0x37   :  { %304 = vmatpush3.bf16.msra.mxu1 %v327_v8 }
  0x38   :  { %305 = vmatprep.subr.bf16.mxu1 %v400_v0 }
  0x3b   :  { %306 = vmatpush3.bf16.msra.mxu1 %v328_v9 }
  0x3c   :  { %307 = vmatprep.subr.bf16.mxu1 %v400_v0 }
  0x3f   :  { %308 = vmatpush3.bf16.msra.mxu1 %v329_v10 }
  0x40   :  { %309 = vmatprep.subr.bf16.mxu1 %v400_v0 }
  0x43   :  { %310 = vmatpush3.bf16.msra.mxu1 %v330_v11 }
  0xea   :  { %v122_v13 = vpop.f32.mrf.mxu0 }
  0xeb   :  { %v123_v14 = vadd.f32 %v265_v12, %v122_v13 }
  0xec   :  { %v293_v15 = vpop.f32.mrf.mxu0 }
  0xed   :  { %v128_v16 = vmul.f32 0.01, %v123_v14 }
  0xee   :  { %v125_v17 = vpop.f32.mrf.mxu0 }
  0xef   :  { %v129_v18 = vmax.f32 %v123_v14, %v128_v16 }
  0xf0   :  { %v294_v19 = vpop.f32.mrf.mxu0 }
  0xf1   :  { %v130_v20 = vpack.c.bf16 %v129_v18, %v129_v18 }
  0xf3   :  { %312 = vmatmul.mubr.bf16.vlgmr.msra.gmra.mxu1 %v130_v20 }
 0x1b3   :  { %v236_v22 = vpop.f32.mrf.mxu1 }
 0x1b4   :  { %v237_v23 = vadd.f32 %v268_v21, %v236_v22 }
 0x1b5   :  { %v313_v24 = vpop.f32.mrf.mxu1 }
 0x1b6   :  { %v242_v25 = vmul.f32 0.01, %v237_v23 }
 0x1b7   :  { %v239_v26 = vpop.f32.mrf.mxu1 }
 0x1b8   :  { %v243_v28 = vmax.f32 %v237_v23, %v242_v25 }
 0x1b9   :  { %v314_v29 = vpop.f32.mrf.mxu1 }
 0x1ba   :  { %v251_v30 = vmul.f32 %v277_v27, %v243_v28 }
 0x1bc   :  { %252 = vadd.xlane.f32.xlu0 %v251_v30 }
 0x245   :  { %v253_v32 = vpop.xlane.xlu0 %252 }
 0x246   :  { %v256_v33 = vadd.f32 %v255_v31, %v253_v32 }
 0x248   :  { %258 = vst.msk [vmem:[%s473_s7] sm:$0xff] %vm257_vm2, %v256_v33 }
 0x249   :  { %263 = vsyncpa [#allocation4], 1 }
 0x24a   :  { %264 = vsyncpa [#allocation6], 1 }

</bundles_post_ra>
